<compile_context>
chip_gen: v7x
topology: tpu7x:2x2x1
jax: 0.10.0
libtpu: 0.0.40
codegen_flags: <defaults>
</compile_context>

<pallas_src>
import jax
import jax.numpy as jnp
from jax import lax
from jax.experimental import pallas as pl
from jax.experimental.pallas import tpu as pltpu


# ------------------------------- helpers -------------------------------------
def _round_up(x, m):
    return ((x + m - 1) // m) * m


def _pick_block(n_pad, candidates=(512, 256, 128)):
    for c in candidates:
        if n_pad % c == 0:
            return c
    return n_pad  # unreachable: n_pad is a multiple of 128 and 128 is a candidate


# --------------------------- pass 1: projection ------------------------------
def _make_proj_kernel(compute_dtype, dot_prec):
    def proj_kernel(x_ref, w_ref, b_ref, o_ref):
        x = x_ref[...].astype(compute_dtype)                   # (C, block)
        y = jnp.dot(w_ref[...], x, preferred_element_type=jnp.float32,
                    precision=dot_prec)                        # (c_all, block) fp32
        o_ref[...] = (y + b_ref[...]).astype(o_ref.dtype)
    return proj_kernel


# ---------------------------- pass 2: attention -------------------------------
def _make_attn_kernel(cq_pad, c, block, n_real, n_pad, compute_dtype, dot_prec):
    need_mask = (n_real != n_pad)

    def attn_kernel(qkv_ref, x_ref, gamma_ref, o_ref, m_scr, l_scr, acc_scr):
        j = pl.program_id(1)                 # key-tile index (output tile)
        i = pl.program_id(2)                 # query-chunk index (reduction axis)
        n_steps = pl.num_programs(2)

        @pl.when(i == 0)
        def _init():
            m_scr[...] = jnp.full((1, block), -jnp.inf, jnp.float32)
            l_scr[...] = jnp.zeros((1, block), jnp.float32)
            acc_scr[...] = jnp.zeros((c, block), jnp.float32)

        # Slices out of the per-batch-resident projected slab: pure VMEM reads (the slab
        # was DMA'd from HBM once per batch), feeding the MXU directly.
        q = qkv_ref[i, pl.ds(0, cq_pad), :]             # (Cq_pad, block) query chunk
        v = qkv_ref[i, pl.ds(2 * cq_pad, c), :]         # (C,      block) value chunk
        k = qkv_ref[j, pl.ds(cq_pad, cq_pad), :]        # (Cq_pad, block) key tile

        # s[m, n] = sum_c q[c, m] * k[c, n]: contract axis 0 of both operands
        # (transposed-LHS MXU matmul — no relayout of q, accumulator stays (C, block)).
        s = lax.dot_general(q, k, (((0,), (0,)), ((), ())),
                            preferred_element_type=jnp.float32,
                            precision=dot_prec)          # (block_q, block_k) fp32

        # ---- online softmax over the query axis (fp32 statistics) ----
        m_prev = m_scr[...]                              # (1, block)
        m_new = jnp.maximum(m_prev, jnp.max(s, axis=0, keepdims=True))
        alpha = jnp.exp(m_prev - m_new)                  # rescale factor (0 at i == 0)
        p32 = jnp.exp(s - m_new)
        if need_mask:
            # Padded *query* rows must not contribute to the softmax (dim=1).  Narrow
            # (block, 1) iota broadcast; masking after the exp keeps everything finite.
            row = i * block + lax.broadcasted_iota(jnp.int32, (block, 1), 0)
            p32 = jnp.where(row < n_real, p32, 0.0)
        p = p32.astype(compute_dtype)                    # single cast, reused below
        l_scr[...] = alpha * l_scr[...] + jnp.sum(p, axis=0, keepdims=True,
                                                  dtype=jnp.float32)
        pv = jnp.dot(v, p, preferred_element_type=jnp.float32,
                     precision=dot_prec)                 # (C, block) fp32
        acc_scr[...] = alpha * acc_scr[...] + pv
        m_scr[...] = m_new

        # ---- finalize: normalize, gamma-residual, lane-dense store ----
        @pl.when(i == n_steps - 1)
        def _finalize():
            l = l_scr[...]
            inv_l = pl.reciprocal(l, approx=True)
            inv_l = inv_l * (2.0 - l * inv_l)            # one Newton step -> fp32 accurate
            out = acc_scr[...] * inv_l                   # (C, block)
            gamma = gamma_ref[0, 0]
            o_ref[...] = (gamma * out + x_ref[...]).astype(o_ref.dtype)

    return attn_kernel


# --------------------------------- wrapper ------------------------------------
def self_attention_pallas(x_bcn, params, *, precision="bfloat16", block=None):
    """x_bcn: (B, C, N) float32.  params: dict from make_params."""
    b, c, n = x_bcn.shape
    wq, bq = params["query"]
    wk, bk = params["key"]
    wv, bv = params["value"]
    cq = wq.shape[0]

    if precision == "float32":
        compute_dtype, dot_prec = jnp.float32, lax.Precision.HIGHEST
    else:
        compute_dtype, dot_prec = jnp.bfloat16, None

    # Pad N to a multiple of 128 -> lane-dense blocks / unmasked stores.
    n_pad = _round_up(n, 128)
    if block is None:
        block = _pick_block(n_pad)
        # v7x has 2 TensorCores: make sure the parallel grid extent can feed both.
        while b * (n_pad // block) < 2 and block > 128:
            block //= 2
    assert n_pad % block == 0 and block % 128 == 0
    n_blocks = n_pad // block

    # Zero-pad Cq (= C // 8) to a multiple of 16 so q/k/v sublane slices of the stacked
    # slab are tile-aligned for bf16 (16, 128) and f32 (8, 128) layouts; zero rows/bias
    # contribute nothing to the q.k contraction.
    cq_pad = max(16, _round_up(cq, 16))
    c_all = 2 * cq_pad + c

    def _pad_rows(w, bias):
        wp = jnp.zeros((cq_pad, c), jnp.float32).at[:cq].set(w)
        bp = jnp.zeros((cq_pad, 1), jnp.float32).at[:cq].set(bias)
        return wp, bp

    wq_p, bq_p = _pad_rows(wq, bq)
    wk_p, bk_p = _pad_rows(wk, bk)
    w_all = jnp.concatenate([wq_p, wk_p, wv], axis=0).astype(compute_dtype)  # (c_all, C)
    b_all = jnp.concatenate([bq_p, bk_p, bv], axis=0)                        # fp32 biases

    # TODO(synk): for N not a multiple of 128 this pad (and the final slice) costs one
    # extra HBM pass over x/out; a masked ragged last tile would remove it.
    x_pad = x_bcn if n_pad == n else jnp.pad(x_bcn, ((0, 0), (0, 0), (0, n_pad - n)))

    itemsize = jnp.dtype(compute_dtype).itemsize

    # ---- pass 1: fused q/k/v projection (computed once per position) ----
    proj_kernel = _make_proj_kernel(compute_dtype, dot_prec)
    qkv = pl.pallas_call(
        proj_kernel,
        out_shape=jax.ShapeDtypeStruct((b, n_blocks, c_all, block), compute_dtype),
        grid_spec=pltpu.PrefetchScalarGridSpec(
            num_scalar_prefetch=0,
            grid=(b, n_blocks),
            in_specs=[
                pl.BlockSpec((None, c, block), lambda bb, t: (bb, 0, t)),
                pl.BlockSpec((c_all, c), lambda bb, t: (0, 0)),   # weights: resident
                pl.BlockSpec((c_all, 1), lambda bb, t: (0, 0)),   # biases: resident
            ],
            out_specs=pl.BlockSpec((None, None, c_all, block),
                                   lambda bb, t: (bb, t, 0, 0)),
        ),
        compiler_params=pltpu.CompilerParams(
            dimension_semantics=("parallel", "parallel"),
            vmem_limit_bytes=32 * 1024 * 1024,
        ),
    )(x_pad, w_all, b_all)

    # ---- pass 2: flash-style attention, softmax over the query axis ----
    # VMEM budget (per TC): resident projected slab (double-buffered by the pipeline) +
    # double-buffered x/out tiles + fp32 accumulator scratch.  Keep well under v7x's
    # 64 MiB/TC.  TODO(synk): for very large C*N fall back to streaming q/v chunks via a
    # blocked BlockSpec instead of keeping the whole slab resident.
    slab_bytes = 2 * c_all * n_pad * itemsize
    tile_bytes = 2 * 2 * c * block * 4
    scratch_bytes = (c + 2) * block * 4
    vmem_est = slab_bytes + tile_bytes + scratch_bytes
    assert vmem_est < 44 * 1024 * 1024, "projected q/k/v slab does not fit in VMEM budget"
    vmem_limit = int(min(max(32 * 1024 * 1024, vmem_est + 8 * 1024 * 1024),
                         48 * 1024 * 1024))

    attn_kernel = _make_attn_kernel(cq_pad, c, block, n, n_pad, compute_dtype, dot_prec)
    out = pl.pallas_call(
        attn_kernel,
        out_shape=jax.ShapeDtypeStruct((b, c, n_pad), jnp.float32),
        grid_spec=pltpu.PrefetchScalarGridSpec(
            num_scalar_prefetch=0,
            grid=(b, n_blocks, n_blocks),   # (batch, key tile, query chunk)
            in_specs=[
                # projected q/k/v slab: block index constant across (j, i) -> DMA'd once
                # per batch element and kept resident in VMEM for the whole reduction.
                pl.BlockSpec((None, n_blocks, c_all, block),
                             lambda bb, j, i: (bb, 0, 0, 0)),
                # residual x tile for this key tile (constant across i -> DMA'd once/(b,j))
                pl.BlockSpec((None, c, block), lambda bb, j, i: (bb, 0, j)),
                # gamma scalar lives in SMEM
                pl.BlockSpec(memory_space=pltpu.MemorySpace.SMEM),
            ],
            out_specs=pl.BlockSpec((None, c, block), lambda bb, j, i: (bb, 0, j)),
            scratch_shapes=[
                pltpu.VMEM((1, block), jnp.float32),    # running max
                pltpu.VMEM((1, block), jnp.float32),    # running sum
                pltpu.VMEM((c, block), jnp.float32),    # output accumulator
            ],
        ),
        compiler_params=pltpu.CompilerParams(
            dimension_semantics=("parallel", "parallel", "arbitrary"),
            vmem_limit_bytes=vmem_limit,
        ),
    )(qkv, x_pad, params["gamma"])

    return out[:, :, :n] if n_pad != n else out


# --------------------------- parameter setup (glue) --------------------------
def xavier_uniform(key, shape, gain):
    # Conv1d weight (out, in, 1): fan_in = in*1, fan_out = out*1
    fan_out, fan_in = shape[0], shape[1] * shape[2]
    bound = gain * jnp.sqrt(6.0 / (fan_in + fan_out))
    return jax.random.uniform(key, shape, jnp.float32, -bound, bound)


def spectral_normalize(w, u):
    # Mirrors SpectralNorm.compute_weight (one power-iteration step, then scale).
    wm = w.reshape(w.shape[0], -1)
    v = wm.T @ u
    v = v / jnp.linalg.norm(v)
    u_new = wm @ v
    u_new = u_new / jnp.linalg.norm(u_new)
    sigma = u_new @ wm @ v
    return w / sigma


def make_params(key, in_channel, gain=2 ** 0.5):
    cq = in_channel // 8
    keys = jax.random.split(key, 6)
    params = {}
    for name, out_ch, (kw, ku) in (("query", cq, (keys[0], keys[1])),
                                   ("key",   cq, (keys[2], keys[3])),
                                   ("value", in_channel, (keys[4], keys[5]))):
        w_orig = xavier_uniform(kw, (out_ch, in_channel, 1), gain)
        u = jax.random.normal(ku, (out_ch,), jnp.float32)
        w_sn = spectral_normalize(w_orig, u)          # forward pre-hook behavior
        params[name] = (w_sn[:, :, 0],                # (out, in) for the kernel
                        jnp.zeros((out_ch, 1), jnp.float32))  # bias zero-init
    params["gamma"] = jnp.zeros((1, 1), jnp.float32)  # nn.Parameter(torch.tensor(0.0))
    return params


def self_attention_forward(x_nchw, params, *, precision="bfloat16", block=None):
    B, C, H, W = x_nchw.shape
    x_bcn = x_nchw.reshape(B, C, H * W)
    out = self_attention_pallas(x_bcn, params, precision=precision, block=block)
    return out.reshape(B, C, H, W)


# ------------------------------ pure-JAX reference ---------------------------
def self_attention_ref(x_nchw, params):
    B, C, H, W = x_nchw.shape
    x = x_nchw.reshape(B, C, H * W)
    wq, bq = params["query"]
    wk, bk = params["key"]
    wv, bv = params["value"]
    hp = lax.Precision.HIGHEST
    q = jnp.einsum("oc,bcn->bon", wq, x, precision=hp) + bq[None]   # (B, Cq, N)
    k = jnp.einsum("oc,bcn->bon", wk, x, precision=hp) + bk[None]   # (B, Cq, N)
    v = jnp.einsum("oc,bcn->bon", wv, x, precision=hp) + bv[None]   # (B, C,  N)
    qk = jnp.einsum("bcm,bcn->bmn", q, k, precision=hp)             # (B, N, N)
    attn = jax.nn.softmax(qk, axis=1)                               # dim=1 !
    out = jnp.einsum("bcm,bmn->bcn", v, attn, precision=hp)         # (B, C, N)
    gamma = params["gamma"][0, 0]
    return (gamma * out + x).reshape(B, C, H, W)


if __name__ == "__main__":
    key = jax.random.PRNGKey(0)
    k_x1, k_x2, k_p = jax.random.split(key, 3)

    C = 32                                   # in_channel=32 -> C//8 = 4
    params = make_params(k_p, C)
    # Use a nonzero gamma so the attention path is actually exercised.
    params["gamma"] = jnp.full((1, 1), 0.7, jnp.float32)

    # Case 1: H=W=16 (N=256, lane-aligned), fp32 MXU path (Precision.HIGHEST), tight
    # check.  block=128 => attention grid (2, 2, 2): exercises multi-tile output and
    # multi-step online-softmax accumulation.
    x1 = jax.random.normal(k_x1, (2, C, 16, 16), jnp.float32)
    out1 = jax.block_until_ready(
        self_attention_forward(x1, params, precision="float32", block=128))
    ref1 = self_attention_ref(x1, params)
    assert out1.shape == x1.shape
    assert jnp.allclose(out1, ref1, atol=1e-4, rtol=1e-4), "fp32 mismatch vs reference"

    # Case 2: H=W=15 (N=225 -> padded to 256, query masking), bf16 MXU path, block=128.
    x2 = jax.random.normal(k_x2, (2, C, 15, 15), jnp.float32)
    out2 = jax.block_until_ready(
        self_attention_forward(x2, params, precision="bfloat16", block=128))
    ref2 = self_attention_ref(x2, params)
    assert out2.shape == x2.shape
    assert jnp.allclose(out2, ref2, atol=5e-2, rtol=5e-2), \
        "bf16 mismatch vs reference (block=128)"

    # Case 3: same input, default (auto-picked) block -> single-step reduction path.
    out3 = jax.block_until_ready(
        self_attention_forward(x2, params, precision="bfloat16"))
    assert jnp.allclose(out3, ref2, atol=5e-2, rtol=5e-2), \
        "bf16 mismatch vs reference (default block)"

    print("KERNEL_OK")
</pallas_src>

<mosaic_0001>
module attributes {stable_mosaic.version = 11 : i64} {
  func.func @proj_kernel(%arg0: i32, %arg1: i32, %arg2: memref<1x32x128xf32, #tpu.memory_space<vmem>>, %arg3: memref<64x32xf32, #tpu.memory_space<vmem>>, %arg4: memref<64x1xf32, #tpu.memory_space<vmem>>, %arg5: memref<1x1x64x128xf32, #tpu.memory_space<vmem>>) attributes {dimension_semantics = [#tpu.dimension_semantics<parallel>, #tpu.dimension_semantics<parallel>], iteration_bounds = array<i64: 2, 2>, scalar_prefetch = 0 : i64, scratch_operands = 0 : i64, tpu.core_type = #tpu.core_type<tc>, window_params = [{transform_indices = @transform_0, window_bounds = array<i64: 1, 32, 128>}, {pipeline_mode = #tpu.pipeline_mode<synchronous>, transform_indices = @transform_1, window_bounds = array<i64: 64, 32>}, {pipeline_mode = #tpu.pipeline_mode<synchronous>, transform_indices = @transform_2, window_bounds = array<i64: 64, 1>}, {transform_indices = @transform_3, window_bounds = array<i64: 1, 1, 64, 128>}]} {
    %c0 = arith.constant 0 : index
    %c0_0 = arith.constant 0 : index
    %c0_1 = arith.constant 0 : index
    %0 = vector.load %arg2[%c0, %c0_0, %c0_1] : memref<1x32x128xf32, #tpu.memory_space<vmem>>, vector<1x32x128xf32>
    %1 = vector.shape_cast %0 : vector<1x32x128xf32> to vector<32x128xf32>
    %c0_2 = arith.constant 0 : index
    %c0_3 = arith.constant 0 : index
    %2 = vector.load %arg3[%c0_2, %c0_3] : memref<64x32xf32, #tpu.memory_space<vmem>>, vector<64x32xf32>
    %cst = arith.constant dense<0.000000e+00> : vector<64x128xf32>
    %3 = tpu.matmul %2, %1, %cst {dimension_numbers = #tpu.dot_dimension_numbers<[1], [0], [0], [1], [0, 0, 1, 1], [], []>, precision = #tpu.contract_precision<fp32>} : vector<64x32xf32>, vector<32x128xf32>, vector<64x128xf32> -> vector<64x128xf32>
    %c0_4 = arith.constant 0 : index
    %c0_5 = arith.constant 0 : index
    %4 = vector.load %arg4[%c0_4, %c0_5] : memref<64x1xf32, #tpu.memory_space<vmem>>, vector<64x1xf32>
    %5 = vector.broadcast %4 : vector<64x1xf32> to vector<64x128xf32>
    %6 = arith.addf %3, %5 : vector<64x128xf32>
    %c0_6 = arith.constant 0 : index
    %c0_7 = arith.constant 0 : index
    %c0_8 = arith.constant 0 : index
    %c0_9 = arith.constant 0 : index
    %7 = vector.load %arg5[%c0_6, %c0_7, %c0_8, %c0_9] : memref<1x1x64x128xf32, #tpu.memory_space<vmem>>, vector<1x1x64x128xf32>
    %8 = vector.shape_cast %7 : vector<1x1x64x128xf32> to vector<64x128xf32>
    %9 = vector.shape_cast %6 : vector<64x128xf32> to vector<1x1x64x128xf32>
    tpu.vector_store %arg5[%c0_6, %c0_7, %c0_8, %c0_9], %9 {strides = array<i32>} : memref<1x1x64x128xf32, #tpu.memory_space<vmem>>, vector<1x1x64x128xf32>,
    return
  }
  func.func @transform_0(%arg0: i32, %arg1: i32) -> (i32, i32, i32) {
    %c0_i32 = arith.constant 0 : i32
    %c0_i32_0 = arith.constant 0 : i32
    return %arg0, %c0_i32, %arg1 : i32, i32, i32
  }
  func.func @transform_1(%arg0: i32, %arg1: i32) -> (i32, i32) {
    %c0_i32 = arith.constant 0 : i32
    %c0_i32_0 = arith.constant 0 : i32
    %c0_i32_1 = arith.constant 0 : i32
    return %c0_i32, %c0_i32_0 : i32, i32
  }
  func.func @transform_2(%arg0: i32, %arg1: i32) -> (i32, i32) {
    %c0_i32 = arith.constant 0 : i32
    %c0_i32_0 = arith.constant 0 : i32
    %c0_i32_1 = arith.constant 0 : i32
    return %c0_i32, %c0_i32_0 : i32, i32
  }
  func.func @transform_3(%arg0: i32, %arg1: i32) -> (i32, i32, i32, i32) {
    %c0_i32 = arith.constant 0 : i32
    %c0_i32_0 = arith.constant 0 : i32
    %c0_i32_1 = arith.constant 0 : i32
    return %arg0, %arg1, %c0_i32, %c0_i32_0 : i32, i32, i32, i32
  }
}

</mosaic_0001>

<bundles_post_ra>
// kernel: tpu_custom_call.1
= control target key start
LH: loop header
LB: loop body
LE: loop exit
PB: predicated region body
PF: predicated region fallthrough
CT: control target
= control target key end

     0   :  { %8 = vsyncpa [#allocation4], 0  ;;  %s2062_s0 = inlined_call_operand.vmem [shape: f32[2,32,256], index: 0, kind: input, shape index: {}]   ;;  %s2063_s1 = inlined_call_operand.vmem [shape: f32[64,32], index: 1, kind: input, shape index: {}]   ;;  %s2064_s2 = inlined_call_operand.vmem [shape: f32[64,1], index: 2, kind: input, shape index: {}]   ;;  %s2065_s3 = inlined_call_operand.hbm [shape: f32[2,2,64,128], index: 3, kind: output, shape index: {}]  }
   0x1   :  { %10 = vsyncpa [#allocation4 + $0x1], 0  ;;  %s1712_s12 = smov 0   ;;  %s1714_s13 = smov 0  }
   0x2   :  { %s1716_s14 = smov 0   ;;  %s1718_s15 = smov 0  }
   0x3   :  { %s1720_s16 = smov 0   ;;  %s1722_s17 = smov 0  }
   0x4   :  { %s1724_s18 = smov 0   ;;  %s1726_s19 = smov 0  }
   0x5 LB: > { %s1212_s20 = sadd.s32 4294967295, %s1686_s19   ;;  %s1213_s21 = sadd.s32 4294967294, %s1686_s19   ;;  %s1686_s19 = sphi %s1726_s19, %s16_s19   ;;  %s1682_s18 = sphi %s1724_s18, %s2075_s18   ;;  %s1678_s17 = sphi %s1722_s17, %s2074_s17   ;;  %s1674_s16 = sphi %s1720_s16, %s2073_s16   ;;  %s1670_s15 = sphi %s1718_s15, %s2072_s15   ;;  %s1666_s14 = sphi %s1716_s14, %s2071_s14   ;;  %s1662_s13 = sphi %s1714_s13, %s2070_s13   ;;  %s1658_s12 = sphi %s1712_s12, %s2069_s12  }
   0x6   : > { %s25_s22 = sadd.s32 1, %s1678_s17  ;;  %s28_s23 = sadd.s32 1, %s1682_s18 }
   0x7   : > { %p26_p0 = scmp.ge.s32.totalorder %s25_s22, 2  ;;  %p44_p1 = scmp.ne.s32.totalorder %s1666_s14, %s1662_s13 }
   0x8   : > { %p45_p2 = scmp.eq.s32.totalorder %s1686_s19, 0  ;;  %p118_p5 = scmp.eq.s32.totalorder %s1212_s20, 3 }
   0x9   : > { %s2077_s22 = smov (%p26_p0, %s25_s22), 0  ;;  %s2079_s23 = smov (!%p26_p0, %s28_s23), %s1682_s18 }
   0xa   : > { %s33_s24 = ssub.s32 %s1678_s17, %s2077_s22  ;;  %p1764_p3 = por %p45_p2, %p44_p1 }
   0xb   : > { %p30_p4 = scmp.ge.s32.totalorder %s2079_s23, 2  ;;  %p123_p6 = scmp.ne.s32.totalorder %s1662_s13, %s1658_s12 }
   0xc   : > { %p124_p7 = scmp.eq.s32.totalorder %s1213_s21, 3  ;;  %p1772_p8 = por %p118_p5, %p44_p1 }
   0xd   : > { %s2081_s23 = smov (%p30_p4, %s2079_s23), 0  ;;  %s37_s30 = sadd.s32 1, %s1666_s14 }
   0xe   : > { %p1776_p9 = por %p124_p7, %p123_p6  ;;  %s32_s28 = ssub.s32 %s1682_s18, %s2081_s23 }
   0xf   : > { %s34_s29 = sor.u32 %s33_s24, %s32_s28  ;;  %p1215_p11 = scmp.ge.s32.totalorder %s1686_s19, 4 }
  0x10   : > { %p35_p10 = scmp.eq.s32.totalorder %s34_s29, 0 }
  0x11   : > { %146 = sbr.rel (%p1215_p11) target bundleno = 32 (0x20), region = 24 }
  0x12   : > { %s1784_s4 = scalar_select %p35_p10, %s1666_s14, %s37_s30  }
  0x18   : > { %149 = sbr.rel (!%p1764_p3) target bundleno = 32 (0x20), region = 28  ;;  %s151_s5 = sand.u32 (%p1764_p3), 1, %s1666_s14  }
  0x19   : > { %s1217_s6 = sshll.u32 (%p1764_p3), %s1682_s18, 3  ;;  %s1216_s7 = sshll.u32 (%p1764_p3), %s151_s5, 5 }
  0x1a   : > { %s155_s8 = sadd.s32 (%p1764_p3), %s1678_s17, %s1217_s6  ;;  %s153_s21 = scalar_lea.vmem (%p1764_p3), [#allocation2], %s1216_s7 }
  0x1b   : > { %s1218_s9 = sshll.u32 (%p1764_p3), %s155_s8, 3 }
  0x1c   : > { %s157_s20 = scalar_lea.vmem (%p1764_p3), %s2062_s0, %s1218_s9 }
  0x1d   : > { %v191_v0 = vld [vmem:[%s157_s20] sm:$0xff] (%p1764_p3)  ;;  %v193_v1 = vld [vmem:[%s157_s20 + $0x10] sm:$0xff] (%p1764_p3) }
  0x1e   : > { %v195_v2 = vld [vmem:[%s157_s20 + $0x20] sm:$0xff] (%p1764_p3)  ;;  %192 = vst [vmem:[%s153_s21] sm:$0xff] (%p1764_p3), %v191_v0  ;;  %194 = vst [vmem:[%s153_s21 + $0x8] sm:$0xff] (%p1764_p3), %v193_v1  ;;  %v197_v3 = vld [vmem:[%s157_s20 + $0x30] sm:$0xff] (%p1764_p3) }
  0x1f   : > { %196 = vst [vmem:[%s153_s21 + $0x10] sm:$0xff] %v195_v2  ;;  %198 = vst [vmem:[%s153_s21 + $0x18] sm:$0xff] %v197_v3 }
  0x20 PF: > { %p1219_p12 = scmp.ge.s32.totalorder %s1686_s19, 1  ;;  %p203_p13 = scmp.lt.s32.totalorder %s1686_s19, 5 }
  0x22   : > { %p204_p0 = pnand %p1219_p12, %p203_p13 }
  0x23   : > { %s1798_s24 = sand.u32 (!%p204_p0), 1, %s1662_s13   ;;  %v237_v4 = vld [vmem:[%s2063_s1] sm:$0xff] (!%p204_p0)  ;;  %vm293_vm0 = vcmask (!%p204_p0), 261120   ;;  %v238_v5 = vld [vmem:[%s2063_s1 + $0x8] sm:$0xff] (!%p204_p0)  ;;  %v239_v6 = vld [vmem:[%s2063_s1 + $0x10] sm:$0xff] (!%p204_p0)  ;;  %v1688_v11 = vmov (!%p204_p0), 0  }
  0x24   : > { %207 = sbr.rel (%p204_p0) target bundleno = 327 (0x147), region = 66  ;;  %s1220_s7 = sshll.u32 (!%p204_p0), %s1798_s24, 5  ;;  %v295_v7 = vsel (!%p204_p0), %vm293_vm0, %v237_v4, 0  ;;  %v298_v8 = vsel (!%p204_p0), %vm293_vm0, %v238_v5, 0  ;;  %v301_v9 = vsel (!%p204_p0), %vm293_vm0, %v239_v6, 0  ;;  %v240_v10 = vld [vmem:[%s2063_s1 + $0x18] sm:$0xff] (!%p204_p0)  ;;  %1591 = vset.pattern.permute.xlu1 (!%p204_p0), %v1688_v11  ;;  %1590 = vset.pattern.permute.xlu0 (!%p204_p0), %v1688_v11 }
  0x25   : > { %v1816_v12 = vand.u32 (!%p204_p0), 4294901760, %v295_v7  ;;  %v1818_v13 = vand.u32 (!%p204_p0), 4294901760, %v298_v8  ;;  %v1820_v14 = vand.u32 (!%p204_p0), 4294901760, %v301_v9  ;;  %v304_v15 = vsel (!%p204_p0), %vm293_vm0, %v240_v10, 0  ;;  %v241_v16 = vld [vmem:[%s2063_s1 + $0x20] sm:$0xff] (!%p204_p0)  ;;  %s212_s20 = scalar_lea.vmem (!%p204_p0), [#allocation2], %s1220_s7 }
  0x26   : > { %v233_v17 = vld [vmem:[%s212_s20] sm:$0xff] (!%p204_p0)  ;;  %v234_v18 = vld [vmem:[%s212_s20 + $0x8] sm:$0xff] (!%p204_p0)  ;;  %v235_v19 = vld [vmem:[%s212_s20 + $0x10] sm:$0xff] (!%p204_p0)  ;;  %v1826_v20 = vand.u32 (!%p204_p0), 4294901760, %v304_v15  ;;  %v307_v21 = vsel (!%p204_p0), %vm293_vm0, %v241_v16, 0  ;;  %s1221_s9 = sshll.u32 (!%p204_p0), %s1798_s24, 6 }
  0x27   : > { %v319_v22 = vand.u32 (!%p204_p0), 4294901760, %v233_v17  ;;  %v322_v23 = vand.u32 (!%p204_p0), 4294901760, %v234_v18  ;;  %v236_v24 = vld [vmem:[%s212_s20 + $0x18] sm:$0xff] (!%p204_p0)  ;;  %v325_v25 = vand.u32 (!%p204_p0), 4294901760, %v235_v19  ;;  %v1830_v26 = vsub.f32 (!%p204_p0), %v295_v7, %v1816_v12  ;;  %v247_v31 = vld [vmem:[%s2064_s2 + $0x10] sm:$0xff] (!%p204_p0)  ;;  %v245_v32 = vld [vmem:[%s2064_s2] sm:$0xff] (!%p204_p0) }
  0x28   : > { %v328_v27 = vand.u32 (!%p204_p0), 4294901760, %v236_v24  ;;  %v1833_v28 = vsub.f32 (!%p204_p0), %v298_v8, %v1818_v13  ;;  %v1836_v29 = vsub.f32 (!%p204_p0), %v301_v9, %v1820_v14  ;;  %v1839_v30 = vsub.f32 (!%p204_p0), %v304_v15, %v1826_v20  ;;  %v242_v37 = vld [vmem:[%s2063_s1 + $0x28] sm:$0xff] (!%p204_p0)  ;;  %265 = vperm.xlu1 (!%p204_p0), %1591, %v247_v31   ;;  %255 = vperm.xlu0 (!%p204_p0), %1590, %v245_v32   ;;  %v248_v46 = vld [vmem:[%s2064_s2 + $0x18] sm:$0xff] (!%p204_p0)  ;;  %v243_v55 = vld [vmem:[%s2063_s1 + $0x30] sm:$0xff] (!%p204_p0)  ;;  %s1990_s10 = scalar_lea.vmem (!%p204_p0), [#allocation3], %s1221_s9  ;;  %s1223_s11 = sshll.u32 (!%p204_p0), %s1670_s15, 3 }
  0x29   : > { %v1847_v33 = vpack.c.bf16 (!%p204_p0), %v322_v23, %v319_v22  ;;  %v389_v34 = vand.u32 (!%p204_p0), 4294901760, %v1830_v26  ;;  %v1850_v35 = vsub.f32 (!%p204_p0), %v233_v17, %v319_v22  ;;  %v1852_v36 = vsub.f32 (!%p204_p0), %v234_v18, %v322_v23  ;;  %v246_v50 = vld [vmem:[%s2064_s2 + $0x8] sm:$0xff] (!%p204_p0)  ;;  %v244_v56 = vld [vmem:[%s2063_s1 + $0x38] sm:$0xff] (!%p204_p0)  ;;  %s1224_s20 = sshll.u32 (!%p204_p0), %s1674_s16, 4  ;;  %s1128_s16 = sshll.u32 (!%p204_p0), %s1990_s10, 4  ;;  %s2006_s16 = int_to_ptr.vmem [resolvable:$true] %s1128_s16 }
  0x2a   : > { %v1857_v38 = vpack.c.bf16 (!%p204_p0), %v328_v27, %v325_v25  ;;  %v399_v39 = vand.u32 (!%p204_p0), 4294901760, %v1833_v28  ;;  %v409_v40 = vand.u32 (!%p204_p0), 4294901760, %v1836_v29  ;;  %v419_v41 = vand.u32 (!%p204_p0), 4294901760, %v1839_v30  ;;  %v250_v1 = vld [vmem:[%s2064_s2 + $0x28] sm:$0xff] (!%p204_p0)  ;;  %s1125_s21 = sadd.s32 (!%p204_p0), %s1224_s20, %s1223_s11  ;;  %s1113_s30 = scalar_lea.sflag (!%p204_p0), [#allocation4], %s1798_s24 }
  0x2b   : > { %1421 = vmatprep.subr.bf16.mxu1 %v1847_v33  ;;  %1445 = vmatprep.subr.bf16.mxu0 %v1847_v33  ;;  %v390_v42 = vsub.f32 %v1830_v26, %v389_v34  ;;  %v470_v43 = vand.u32 4294901760, %v1850_v35  ;;  %v477_v44 = vand.u32 4294901760, %v1852_v36  ;;  %v1867_v45 = vand.u32 4294901760, %v307_v21  ;;  %s1225_s15 = sshll.u32 %s1125_s21, 7  ;;  %s1592_s5 = scalar_lea.vmem %s2006_s16, 1024 }
  0x2c   : > { %1423 = vmatpush3.bf16.msra.mxu1 %v1847_v33  ;;  %1447 = vmatpush3.bf16.msra.mxu0 %v1847_v33  ;;  %v400_v47 = vsub.f32 %v1833_v28, %v399_v39  ;;  %v410_v48 = vsub.f32 %v1836_v29, %v409_v40  ;;  %v310_v49 = vsel %vm293_vm0, %v242_v37, 0  ;;  %v420_v59 = vsub.f32 %v1839_v30, %v419_v41  ;;  %s2004_s29 = scalar_lea.hbm %s2065_s3, %s1225_s15  ;;  %p1593_p1 = scmp.ne.s32.totalorder %s2006_s16, %s1592_s5 }
  0x2d   : > { %1425 = vmatprep.subr.bf16.mxu1 %v1857_v38  ;;  %1449 = vmatprep.subr.bf16.mxu0 %v1857_v38  ;;  %v391_v51 = vand.u32 4294901760, %v390_v42  ;;  %v471_v52 = vsub.f32 %v1850_v35, %v470_v43  ;;  %v478_v53 = vsub.f32 %v1852_v36, %v477_v44  ;;  %v1452_v54 = vpack.c.bf16 %v477_v44, %v470_v43  ;;  %s1689_s6 = smov [#allocation3]  }
  0x2e   : > { %1368 = vmatprep.mubr.f32.mxu0 %v389_v34  ;;  %v401_v57 = vand.u32 4294901760, %v400_v47  ;;  %v411_v58 = vand.u32 4294901760, %v410_v48  ;;  %v1896_v60 = vsub.f32 %v307_v21, %v1867_v45  ;;  %270 = vperm.xlu1 %1591, %v248_v46   ;;  %v1898_v63 = vand.u32 4294901760, %v310_v49  ;;  %v249_v21 = vld [vmem:[%s2064_s2 + $0x20] sm:$0xff]  ;;  %p1594_p2 = pnand %p1593_p1, %p1772_p8  ;;  %s1596_s7 = sshll.u32 %s1689_s6, 4  ;;  %s1597_s7 = int_to_ptr.vmem [resolvable:$false] %s1596_s7 }
  0x2f   : > { %1308 = vmatprep.mubr.f32.mxu1 %v391_v51  ;;  %v472_v61 = vand.u32 4294901760, %v471_v52  ;;  %v479_v62 = vand.u32 4294901760, %v478_v53  ;;  %v1900_v0 = vsub.f32 %v235_v19, %v325_v25  ;;  %260 = vperm.xlu0 %1590, %v246_v50   ;;  %v1908_v3 = vsub.f32 %v236_v24, %v328_v27  ;;  %s1598_s8 = scalar_lea.vmem %s1597_s7, 2048  ;;  %p1599_p4 = scmp.lt.s32.totalorder %s2006_s16, %s1597_s7 }
  0x30   : > { %1427 = vmatpush3.bf16.msra.mxu1 %v1857_v38  ;;  %1451 = vmatpush3.bf16.msra.mxu0 %v1857_v38  ;;  %v429_v2 = vand.u32 4294901760, %v1896_v60  ;;  %v313_v4 = vsel %vm293_vm0, %v243_v55, 0  ;;  %v316_v5 = vsel %vm293_vm0, %v244_v56, 0  ;;  %v1913_v7 = vsub.f32 %v310_v49, %v1898_v63  ;;  %p1595_p3 = pneg %p1594_p2  ;;  %p1600_p5 = scmp.lt.s32.totalorder %s1598_s8, %s1592_s5 }
  0x31   : > { %v1428_v6 = vpack.c.bf16 %v479_v62, %v472_v61  ;;  %1453 = vmatprep.subr.bf16.mxu0 %v1452_v54  ;;  %v484_v8 = vand.u32 4294901760, %v1900_v0  ;;  %v1916_v9 = vand.u32 4294901760, %v313_v4  ;;  %v491_v11 = vand.u32 4294901760, %v1908_v3 }
  0x32   : > { %v430_v10 = vsub.f32 %v1896_v60, %v429_v2  ;;  %v1920_v15 = vand.u32 4294901760, %v316_v5  ;;  %280 = vperm.xlu1 %1591, %v250_v1   ;;  %v421_v16 = vand.u32 4294901760, %v420_v59  ;;  %v439_v17 = vand.u32 4294901760, %v1913_v7  ;;  %p1601_p6 = por %p1600_p5, %p1599_p4 }
  0x33   : > { %1309 = vmatmul.mubr.f32.vlgmr.msra.gmra.mrb[0].mxu1 %v401_v57  ;;  %1429 = vmatprep.subr.bf16.mxu1 %v1428_v6  ;;  %v485_v18 = vsub.f32 %v1900_v0, %v484_v8  ;;  %v1925_v19 = vsub.f32 %v313_v4, %v1916_v9  ;;  %v492_v23 = vsub.f32 %v1908_v3, %v491_v11 }
  0x34   : > { %1369 = vmatmul.mubr.f32.vlgmr.msra.gmra.mrb[0].mxu0 %v399_v39  ;;  %1431 = vmatpush3.bf16.msra.mxu1 %v1428_v6  ;;  %v431_v22 = vand.u32 4294901760, %v430_v10  ;;  %v1456_v24 = vpack.c.bf16 %v491_v11, %v484_v8  ;;  %v1932_v25 = vsub.f32 %v316_v5, %v1920_v15  ;;  %v440_v27 = vsub.f32 %v1913_v7, %v439_v17  ;;  %v252_v39 = vld [vmem:[%s2064_s2 + $0x38] sm:$0xff]  ;;  %p1602_p7 = pnand %p1601_p6, %p1595_p3 }
  0x35   : > { %1311 = vmatprep.mubr.f32.mxu1 %v411_v58  ;;  %1371 = vmatprep.mubr.f32.mxu0 %v409_v40  ;;  %v486_v31 = vand.u32 4294901760, %v485_v18  ;;  %v449_v32 = vand.u32 4294901760, %v1925_v19  ;;  %v493_v34 = vand.u32 4294901760, %v492_v23  ;;  %v1436_v47 = vpack.c.bf16 %v1852_v36, %v1850_v35 }
  0x36   : > { %1455 = vmatpush3.bf16.msra.mxu0 %v1452_v54  ;;  %v459_v37 = vand.u32 4294901760, %v1932_v25  ;;  %275 = vperm.xlu0 %1590, %v249_v21   ;;  %v441_v42 = vand.u32 4294901760, %v440_v27  ;;  %v1440_v35 = vpack.c.bf16 %v1908_v3, %v1900_v0 }
  0x37   : > { %1312 = vmatmul.mubr.f32.gmra.mrb[2].mxu1 %v421_v16  ;;  %1457 = vmatprep.subr.bf16.mxu0 %v1456_v24  ;;  %v450_v43 = vsub.f32 %v1925_v19, %v449_v32  ;;  %v1432_v40 = vpack.c.bf16 %v493_v34, %v486_v31 }
  0x38   : > { %1372 = vmatmul.mubr.f32.gmra.mrb[2].mxu0 %v419_v41  ;;  %1314 = vmatprep.mubr.f32.mxu1 %v431_v22  ;;  %v460_v44 = vsub.f32 %v1932_v25, %v459_v37  ;;  %v251_v41 = vld [vmem:[%s2064_s2 + $0x30] sm:$0xff] }
  0x39   : > { %1374 = vmatprep.mubr.f32.mxu0 %v429_v2  ;;  %v451_v46 = vand.u32 4294901760, %v450_v43  ;;  %290 = vperm.xlu1 %1591, %v252_v39  }
  0x3a   : > { %1433 = vmatprep.subr.bf16.mxu1 %v1432_v40  ;;  %1459 = vmatpush3.bf16.msra.mxu0 %v1456_v24  ;;  %v461_v48 = vand.u32 4294901760, %v460_v44 }
  0x3b   : > { %1315 = vmatmul.mubr.f32.gmra.mrb[4].mxu1 %v441_v42  ;;  %1461 = vmatprep.subr.bf16.mxu0 %v1847_v33 }
  0x3c   : > { %1375 = vmatmul.mubr.f32.gmra.mrb[4].mxu0 %v439_v17  ;;  %1435 = vmatpush3.bf16.msra.mxu1 %v1432_v40 }
  0x3d   : > { %1317 = vmatprep.mubr.f32.mxu1 %v451_v46  ;;  %1377 = vmatprep.mubr.f32.mxu0 %v449_v32 }
  0x3e   : > { %1437 = vmatprep.subr.bf16.mxu1 %v1436_v47  ;;  %285 = vperm.xlu0 %1590, %v251_v41  }
  0x3f   : > { %1318 = vmatmul.mubr.f32.gmra.mrb[6].mxu1 %v461_v48 }
  0x40   : > { %1378 = vmatmul.mubr.f32.gmra.mrb[6].mxu0 %v459_v37  ;;  %1328 = vmatprep.mubr.f32.mxu1 %v1816_v12 }
  0x41   : > { %1388 = vmatprep.mubr.f32.mxu0 %v1816_v12 }
  0x43   : > { %1329 = vmatmul.mubr.f32.vlgmr.msra.gmra.mrb[0].mxu1 %v1818_v13 }
  0x44   : > { %1389 = vmatmul.mubr.f32.vlgmr.msra.gmra.mrb[0].mxu0 %v1818_v13  ;;  %1439 = vmatpush3.bf16.msra.mxu1 %v1436_v47 }
  0x45   : > { %1331 = vmatprep.mubr.f32.mxu1 %v1820_v14  ;;  %1391 = vmatprep.mubr.f32.mxu0 %v1820_v14 }
  0x46   : > { %1463 = vmatpush3.bf16.msra.mxu0 %v1847_v33  ;;  %1441 = vmatprep.subr.bf16.mxu1 %v1440_v35 }
  0x47   : > { %1332 = vmatmul.mubr.f32.gmra.mrb[2].mxu1 %v1826_v20  ;;  %1465 = vmatprep.subr.bf16.mxu0 %v1857_v38 }
  0x48   : > { %1392 = vmatmul.mubr.f32.gmra.mrb[2].mxu0 %v1826_v20  ;;  %1334 = vmatprep.mubr.f32.mxu1 %v1867_v45 }
  0x49   : > { %1394 = vmatprep.mubr.f32.mxu0 %v1867_v45  ;;  %1443 = vmatpush3.bf16.msra.mxu1 %v1440_v35 }
  0x4a   : > { %1467 = vmatpush3.bf16.msra.mxu0 %v1857_v38 }
  0x4b   : > { %1335 = vmatmul.mubr.f32.gmra.mrb[4].mxu1 %v1898_v63 }
  0x4c   : > { %1395 = vmatmul.mubr.f32.gmra.mrb[4].mxu0 %v1898_v63  ;;  %1337 = vmatprep.mubr.f32.mxu1 %v1916_v9 }
  0x4d   : > { %1397 = vmatprep.mubr.f32.mxu0 %v1916_v9 }
  0x4f   : > { %1338 = vmatmul.mubr.f32.gmra.mrb[6].mxu1 %v1920_v15 }
  0x50   : > { %1398 = vmatmul.mubr.f32.gmra.mrb[6].mxu0 %v1920_v15  ;;  %1348 = vmatprep.mubr.f32.mxu1 %v1830_v26 }
  0x51   : > { %1408 = vmatprep.mubr.f32.mxu0 %v1816_v12 }
  0x53   : > { %1349 = vmatmul.mubr.f32.vlgmr.msra.gmra.mrb[0].mxu1 %v1833_v28 }
  0x54   : > { %1409 = vmatmul.mubr.f32.vlgmr.msra.gmra.mrb[0].mxu0 %v1818_v13  ;;  %1351 = vmatprep.mubr.f32.mxu1 %v1836_v29 }
  0x55   : > { %1411 = vmatprep.mubr.f32.mxu0 %v1820_v14 }
  0x57   : > { %1352 = vmatmul.mubr.f32.gmra.mrb[2].mxu1 %v1839_v30 }
  0x58   : > { %1412 = vmatmul.mubr.f32.gmra.mrb[2].mxu0 %v1826_v20  ;;  %1354 = vmatprep.mubr.f32.mxu1 %v1896_v60 }
  0x59   : > { %1414 = vmatprep.mubr.f32.mxu0 %v1867_v45 }
  0x5b   : > { %1355 = vmatmul.mubr.f32.gmra.mrb[4].mxu1 %v1913_v7 }
  0x5c   : > { %1415 = vmatmul.mubr.f32.gmra.mrb[4].mxu0 %v1898_v63  ;;  %1357 = vmatprep.mubr.f32.mxu1 %v1925_v19 }
  0x5d   : > { %1417 = vmatprep.mubr.f32.mxu0 %v1916_v9 }
  0x5f   : > { %1358 = vmatmul.mubr.f32.gmra.mrb[6].mxu1 %v1932_v25 }
  0x60   : > { %1418 = vmatmul.mubr.f32.gmra.mrb[6].mxu0 %v1920_v15 }
  0xa7   : > { %v266_v12 = vpop.permute.xlu1 %265  ;;  %v256_v13 = vpop.permute.xlu0 %255 }
  0xad   : > { %v271_v14 = vpop.permute.xlu1 %270 }
  0xae   : > { %v261_v20 = vpop.permute.xlu0 %260 }
  0xb1   : > { %v281_v45 = vpop.permute.xlu1 %280 }
  0xb5   : > { %v276_v54 = vpop.permute.xlu0 %275 }
  0xb8   : > { %v291_v1 = vpop.permute.xlu1 %290 }
  0xbd   : > { %v286_v3 = vpop.permute.xlu0 %285 }
 0x126   : > { %v1350_v26 = vpop.f32.mrb[0].mxu1 }
 0x127   : > { %v1468_v28 = vadd.f32 %v1350_v26, %v261_v20  ;;  %v1410_v29 = vpop.f32.mrb[0].mxu0  ;;  %v676_v30 = vpop.f32.mrb[1].mxu1 }
 0x128   : > { %v1470_v33 = vadd.f32 %v676_v30, %v256_v13  ;;  %v1058_v36 = vpop.f32.mrb[1].mxu0 }
 0x129   : > { %v1469_v38 = vadd.f32 %v1468_v28, %v1410_v29 }
 0x12a   : > { %v1471_v49 = vadd.f32 %v1470_v33, %v1058_v36  ;;  %v1353_v50 = vpop.f32.mrb[2].mxu1 }
 0x12b   : > { %1105 = vst [vmem:[%s1990_s10 + $0x8] sm:$0xff] %v1469_v38  ;;  %v1472_v51 = vadd.f32 %v1353_v50, %v271_v14  ;;  %v1413_v52 = vpop.f32.mrb[2].mxu0  ;;  %v690_v53 = vpop.f32.mrb[3].mxu1 }
 0x12c   : > { %1104 = vst [vmem:[%s1990_s10] sm:$0xff] %v1471_v49  ;;  %v1474_v55 = vadd.f32 %v690_v53, %v266_v12  ;;  %v1070_v56 = vpop.f32.mrb[3].mxu0 }
 0x12d   : > { %v1473_v57 = vadd.f32 %v1472_v51, %v1413_v52 }
 0x12e   : > { %v1475_v58 = vadd.f32 %v1474_v55, %v1070_v56  ;;  %v1356_v59 = vpop.f32.mrb[4].mxu1 }
 0x12f   : > { %1107 = vst [vmem:[%s1990_s10 + $0x18] sm:$0xff] %v1473_v57  ;;  %v1476_v60 = vadd.f32 %v1356_v59, %v281_v45  ;;  %v1416_v61 = vpop.f32.mrb[4].mxu0  ;;  %v704_v62 = vpop.f32.mrb[5].mxu1 }
 0x130   : > { %1106 = vst [vmem:[%s1990_s10 + $0x10] sm:$0xff] %v1475_v58  ;;  %v1478_v63 = vadd.f32 %v704_v62, %v276_v54  ;;  %v1082_v0 = vpop.f32.mrb[5].mxu0 }
 0x131   : > { %v1477_v2 = vadd.f32 %v1476_v60, %v1416_v61 }
 0x132   : > { %v1479_v4 = vadd.f32 %v1478_v63, %v1082_v0  ;;  %v1359_v5 = vpop.f32.mrb[6].mxu1 }
 0x133   : > { %1109 = vst [vmem:[%s1990_s10 + $0x28] sm:$0xff] %v1477_v2  ;;  %v1480_v6 = vadd.f32 %v1359_v5, %v291_v1  ;;  %v1419_v7 = vpop.f32.mrb[6].mxu0  ;;  %v718_v8 = vpop.f32.mrb[7].mxu1 }
 0x134   : > { %1108 = vst [vmem:[%s1990_s10 + $0x20] sm:$0xff] %v1479_v4  ;;  %v1482_v9 = vadd.f32 %v718_v8, %v286_v3  ;;  %v1094_v10 = vpop.f32.mrb[7].mxu0 }
 0x135   : > { %v1481_v11 = vadd.f32 %v1480_v6, %v1419_v7 }
 0x136   : > { %v1483_v15 = vadd.f32 %v1482_v9, %v1094_v10 }
 0x137   : > { %1111 = vst [vmem:[%s1990_s10 + $0x38] sm:$0xff] %v1481_v11 }
 0x138   : > { %1110 = vst [vmem:[%s1990_s10 + $0x30] sm:$0xff] %v1483_v15 }
 0x139   : > { %1605 = shalt.err (!%p1602_p7)
}
 0x13a   : > { %s1606_s9 = scalar_lea.hbm %s2004_s29, 1024  ;;  %s1610_s20 = scalar_lea.hbm %s2065_s3, 4096 }
 0x13b   : > { %p1607_p10 = scmp.ne.s32.totalorder %s2004_s29, %s1606_s9  ;;  %p1611_p13 = scmp.lt.u32.totalorder %s2004_s29, %s2065_s3 }
 0x13c   : > { %p1612_p0 = scmp.lt.u32.totalorder %s1610_s20, %s1606_s9  ;;  %p1614_p2 = scmp.lt.u32.totalorder %s1606_s9, %s2004_s29 }
 0x13d   : > { %p1608_p11 = pnand %p1607_p10, %p1772_p8 }
 0x13e   : > { %p1613_p1 = por %p1612_p0, %p1611_p13 }
 0x13f   : > { %p1609_p12 = pneg %p1608_p11 }
 0x140   : > { %p1615_p3 = por %p1614_p2, %p1613_p1 }
 0x142   : > { %p1616_p4 = pnand %p1615_p3, %p1609_p12 }
 0x144   : > { %1619 = shalt.err (!%p1616_p4)
}
 0x145   : > { %s1690_s25 = smov 128   ;;  %s1691_s28 = smov 8  }
 0x146   : > { %1516 = dma.vmem_to_hbm [thread:$0]  (%p1772_p8), %s2006_s16, 1024, %s2004_s29, %s1113_s30, %s1690_s25, %s1690_s25, %s1691_s28  }
 0x147 PF: > { %p1522_p5 = scmp.ge.s32.totalorder %s1686_s19, 2  ;;  %s1143_s5 = sand.u32 1, %s1658_s12  }
 0x148   : > { %s1144_s6 = scalar_lea.sflag [#allocation4], %s1143_s5 }
 0x149   : > { %p1519_p6 = pnand %p1522_p5, %p1776_p9 }
 0x14b   : > { %1653 = dma.done.wait (!%p1519_p6), %s1144_s6, 1024  }
 0x14c   : > { %1655 = vsyncadd (!%p1519_p6), %s1144_s6, 4294966272  ;;  %s16_s19 = sadd.s32 1, %s1686_s19   ;;  %s2069_s12 = smov %s1662_s13 }
 0x14d   : > { %p13_p7 = scmp.ge.s32.totalorder %s16_s19, 6   ;;  %s2070_s13 = smov %s1666_s14 }
 0x14e   : > { %s2071_s14 = smov %s1784_s4  ;;  %s2072_s15 = smov %s1678_s17 }
 0x14f   : > { %s2073_s16 = smov %s1682_s18  ;;  %s2074_s17 = smov %s2077_s22 }
 0x150   : > { %s2075_s18 = smov %s2081_s23  ;;  %15 = sbr.rel (!%p13_p7) target bundleno = 5 (0x5), region = 110 }
 0x157   :  { %1149 = vsyncpa [#allocation4], 1 }
 0x158   :  { %1151 = vsyncpa [#allocation4 + $0x1], 1 }

</bundles_post_ra>
